<compile_context>
chip_gen: v5e
topology: v5e:2x2
jax: 0.10.0
libtpu: 0.0.40
codegen_flags: <defaults>
</compile_context>

<pallas_src>
import jax
import jax.numpy as jnp
from jax.experimental import pallas as pl
from jax.experimental.pallas import tpu as pltpu

HID = 128   # lane-dense padded hidden width
OUT = 10    # true output width (padded to HID inside the kernel)


def dnn_kernel(x_ref, w1_ref, wstack_ref, bstack_ref, o_ref):
    cdt = w1_ref.dtype                     # matmul-input dtype (f32 or bf16)
    h = x_ref[...].astype(cdt)

    # hidden_layer1: Linear(F, 128) + ReLU (+ Dropout(0.2) = identity in eval)
    acc = jnp.dot(h, w1_ref[...], preferred_element_type=jnp.float32)
    acc = acc + bstack_ref[0:1, :]
    h = jnp.maximum(acc, 0.0).astype(cdt)

    # hidden_layer2..5: Linear + ReLU, all zero-padded to 128x128 so every
    # intermediate activation is a full [tile_b, 128] lane-dense tile.
    # (Padding is exact: zero rows/cols + zero bias + ReLU(0)=0.)
    for k in range(4):
        acc = jnp.dot(h, wstack_ref[k], preferred_element_type=jnp.float32)
        acc = acc + bstack_ref[k + 1:k + 2, :]
        h = jnp.maximum(acc, 0.0).astype(cdt)

    # output_layer: Linear(32, 10), output lanes zero-padded to 128 so the
    # HBM writeback is an unmasked, lane-dense store.
    acc = jnp.dot(h, wstack_ref[4], preferred_element_type=jnp.float32)
    acc = acc + bstack_ref[5:6, :]
    o_ref[...] = acc.astype(o_ref.dtype)


def _round_up(n, m):
    return ((n + m - 1) // m) * m


def pack_params(params, param_dtype=jnp.float32):
    """Pack per-layer (W[in,out], b[1,out]) into lane-dense padded arrays.

    Returns:
      w1p    [F, 128]        first-layer weight (param_dtype)
      wstack [5, 128, 128]   layers 2..6 zero-padded to 128x128 (param_dtype)
      bstack [6, 128]        all biases zero-padded on lanes (float32)
    """
    w1, b1 = params[0]
    w1p = w1.astype(param_dtype)
    ws = []
    bs = [jnp.zeros((1, HID), jnp.float32).at[:, :b1.shape[1]].set(b1)]
    for (w, b) in params[1:]:
        wp = jnp.zeros((HID, HID), param_dtype)
        wp = wp.at[:w.shape[0], :w.shape[1]].set(w.astype(param_dtype))
        ws.append(wp)
        bs.append(jnp.zeros((1, HID), jnp.float32).at[:, :b.shape[1]].set(b))
    wstack = jnp.stack(ws, axis=0)
    bstack = jnp.concatenate(bs, axis=0)
    return w1p, wstack, bstack


def dnn_forward(x, params, *, tile_b=256, param_dtype=jnp.float32):
    """x: [B, F] float32. params: list of 6 (W[in,out], b[1,out]) pairs."""
    B, F = x.shape
    w1p, wstack, bstack = pack_params(params, param_dtype)

    # Batch tile: multiple of 8, no larger than needed; pad B instead of assert.
    tile_b = max(8, min(_round_up(tile_b, 8), _round_up(B, 8)))
    B_pad = _round_up(B, tile_b)
    if B_pad != B:
        x = jnp.pad(x, ((0, B_pad - B), (0, 0)))
    grid = (B_pad // tile_b,)
    # Note: on v7x keep at least 2 grid steps (even count) for large B so both
    # TensorCores get work; with tile_b=256 any B >= 512 satisfies this.

    out = pl.pallas_call(
        dnn_kernel,
        out_shape=jax.ShapeDtypeStruct((B_pad, HID), jnp.float32),
        grid_spec=pltpu.PrefetchScalarGridSpec(
            num_scalar_prefetch=0,
            grid=grid,
            in_specs=[
                # x tiled along batch; feature dim (small) taken whole.
                pl.BlockSpec((tile_b, F), lambda i: (i, 0)),
                # Weights/biases: whole arrays, constant block index -> fetched
                # once and reused across all grid steps (~200 KiB total).
                pl.BlockSpec((F, HID), lambda i: (0, 0)),
                pl.BlockSpec((5, HID, HID), lambda i: (0, 0, 0)),
                pl.BlockSpec((6, HID), lambda i: (0, 0)),
            ],
            out_specs=pl.BlockSpec((tile_b, HID), lambda i: (i, 0)),
        ),
        compiler_params=pltpu.CompilerParams(
            dimension_semantics=("parallel",)),
    )(x, w1p, wstack, bstack)

    return out[:B, :OUT]


def init_params(num_features, key):
    """Deterministic init matching nn.Linear shapes (weights stored as [in, out])."""
    dims = [num_features, 128, 128, 64, 64, 32, 10]
    params = []
    for li in range(len(dims) - 1):
        fan_in, fan_out = dims[li], dims[li + 1]
        key, kw, kb = jax.random.split(key, 3)
        bound = 1.0 / jnp.sqrt(jnp.float32(fan_in))
        w = jax.random.uniform(kw, (fan_in, fan_out), jnp.float32, -bound, bound)
        b = jax.random.uniform(kb, (1, fan_out), jnp.float32, -bound, bound)
        params.append((w, b))
    return params


def reference_forward(x, params):
    h = x
    n = len(params)
    for i, (w, b) in enumerate(params):
        h = h @ w + b
        if i < n - 1:
            h = jnp.maximum(h, 0.0)
    return h


if __name__ == "__main__":
    key = jax.random.PRNGKey(0)
    B, F = 10, 32  # B deliberately not a multiple of 8 to exercise batch padding
    kx, kp = jax.random.split(key)
    x = jax.random.normal(kx, (B, F), jnp.float32)
    params = init_params(F, kp)
    ref = reference_forward(x, params)

    # f32 weights: exact match against pure-JAX reference.
    out = jax.block_until_ready(
        dnn_forward(x, params, tile_b=256, param_dtype=jnp.float32))
    assert out.shape == (B, OUT)
    assert jnp.allclose(out, ref, atol=1e-4, rtol=1e-4), "f32 mismatch vs reference"

    # bf16 weights / MXU inputs (v6e/v7x recommendation), f32 accumulation.
    out_bf16 = jax.block_until_ready(
        dnn_forward(x, params, tile_b=256, param_dtype=jnp.bfloat16))
    assert out_bf16.shape == (B, OUT)
    assert float(jnp.max(jnp.abs(out_bf16 - ref))) < 0.25, "bf16 path diverged"

    print("KERNEL_OK")
</pallas_src>

<mosaic_0001>
module attributes {stable_mosaic.version = 11 : i64} {
  func.func @dnn_kernel(%arg0: i32, %arg1: memref<16x32xf32, #tpu.memory_space<vmem>>, %arg2: memref<32x128xf32, #tpu.memory_space<vmem>>, %arg3: memref<5x128x128xf32, #tpu.memory_space<vmem>>, %arg4: memref<6x128xf32, #tpu.memory_space<vmem>>, %arg5: memref<16x128xf32, #tpu.memory_space<vmem>>) attributes {dimension_semantics = [#tpu.dimension_semantics<parallel>], iteration_bounds = array<i64: 1>, scalar_prefetch = 0 : i64, scratch_operands = 0 : i64, tpu.core_type = #tpu.core_type<tc>, window_params = [{transform_indices = @transform_0, window_bounds = array<i64: 16, 32>}, {pipeline_mode = #tpu.pipeline_mode<synchronous>, transform_indices = @transform_1, window_bounds = array<i64: 32, 128>}, {pipeline_mode = #tpu.pipeline_mode<synchronous>, transform_indices = @transform_2, window_bounds = array<i64: 5, 128, 128>}, {pipeline_mode = #tpu.pipeline_mode<synchronous>, transform_indices = @transform_3, window_bounds = array<i64: 6, 128>}, {transform_indices = @transform_4, window_bounds = array<i64: 16, 128>}]} {
    %c0 = arith.constant 0 : index
    %c0_0 = arith.constant 0 : index
    %0 = vector.load %arg1[%c0, %c0_0] : memref<16x32xf32, #tpu.memory_space<vmem>>, vector<16x32xf32>
    %c0_1 = arith.constant 0 : index
    %c0_2 = arith.constant 0 : index
    %1 = vector.load %arg2[%c0_1, %c0_2] : memref<32x128xf32, #tpu.memory_space<vmem>>, vector<32x128xf32>
    %cst = arith.constant dense<0.000000e+00> : vector<16x128xf32>
    %2 = tpu.matmul %0, %1, %cst {dimension_numbers = #tpu.dot_dimension_numbers<[1], [0], [0], [1], [0, 0, 1, 1], [], []>} : vector<16x32xf32>, vector<32x128xf32>, vector<16x128xf32> -> vector<16x128xf32>
    %c0_3 = arith.constant 0 : index
    %c0_4 = arith.constant 0 : index
    %3 = vector.load %arg4[%c0_3, %c0_4] : memref<6x128xf32, #tpu.memory_space<vmem>>, vector<1x128xf32>
    %4 = vector.broadcast %3 : vector<1x128xf32> to vector<16x128xf32>
    %5 = arith.addf %2, %4 : vector<16x128xf32>
    %cst_5 = arith.constant 0.000000e+00 : f32
    %6 = vector.broadcast %cst_5 : f32 to vector<16x128xf32>
    %7 = arith.maximumf %5, %6 : vector<16x128xf32>
    %c0_6 = arith.constant 0 : index
    %c0_7 = arith.constant 0 : index
    %c0_8 = arith.constant 0 : index
    %8 = vector.load %arg3[%c0_6, %c0_7, %c0_8] : memref<5x128x128xf32, #tpu.memory_space<vmem>>, vector<1x128x128xf32>
    %9 = vector.shape_cast %8 : vector<1x128x128xf32> to vector<128x128xf32>
    %cst_9 = arith.constant dense<0.000000e+00> : vector<16x128xf32>
    %10 = tpu.matmul %7, %9, %cst_9 {dimension_numbers = #tpu.dot_dimension_numbers<[1], [0], [0], [1], [0, 0, 1, 1], [], []>} : vector<16x128xf32>, vector<128x128xf32>, vector<16x128xf32> -> vector<16x128xf32>
    %c1 = arith.constant 1 : index
    %c0_10 = arith.constant 0 : index
    %11 = vector.load %arg4[%c1, %c0_10] : memref<6x128xf32, #tpu.memory_space<vmem>>, vector<1x128xf32>
    %12 = vector.broadcast %11 : vector<1x128xf32> to vector<16x128xf32>
    %13 = arith.addf %10, %12 : vector<16x128xf32>
    %cst_11 = arith.constant 0.000000e+00 : f32
    %14 = vector.broadcast %cst_11 : f32 to vector<16x128xf32>
    %15 = arith.maximumf %13, %14 : vector<16x128xf32>
    %c1_12 = arith.constant 1 : index
    %c0_13 = arith.constant 0 : index
    %c0_14 = arith.constant 0 : index
    %16 = vector.load %arg3[%c1_12, %c0_13, %c0_14] : memref<5x128x128xf32, #tpu.memory_space<vmem>>, vector<1x128x128xf32>
    %17 = vector.shape_cast %16 : vector<1x128x128xf32> to vector<128x128xf32>
    %cst_15 = arith.constant dense<0.000000e+00> : vector<16x128xf32>
    %18 = tpu.matmul %15, %17, %cst_15 {dimension_numbers = #tpu.dot_dimension_numbers<[1], [0], [0], [1], [0, 0, 1, 1], [], []>} : vector<16x128xf32>, vector<128x128xf32>, vector<16x128xf32> -> vector<16x128xf32>
    %c2 = arith.constant 2 : index
    %c0_16 = arith.constant 0 : index
    %19 = vector.load %arg4[%c2, %c0_16] : memref<6x128xf32, #tpu.memory_space<vmem>>, vector<1x128xf32>
    %20 = vector.broadcast %19 : vector<1x128xf32> to vector<16x128xf32>
    %21 = arith.addf %18, %20 : vector<16x128xf32>
    %cst_17 = arith.constant 0.000000e+00 : f32
    %22 = vector.broadcast %cst_17 : f32 to vector<16x128xf32>
    %23 = arith.maximumf %21, %22 : vector<16x128xf32>
    %c2_18 = arith.constant 2 : index
    %c0_19 = arith.constant 0 : index
    %c0_20 = arith.constant 0 : index
    %24 = vector.load %arg3[%c2_18, %c0_19, %c0_20] : memref<5x128x128xf32, #tpu.memory_space<vmem>>, vector<1x128x128xf32>
    %25 = vector.shape_cast %24 : vector<1x128x128xf32> to vector<128x128xf32>
    %cst_21 = arith.constant dense<0.000000e+00> : vector<16x128xf32>
    %26 = tpu.matmul %23, %25, %cst_21 {dimension_numbers = #tpu.dot_dimension_numbers<[1], [0], [0], [1], [0, 0, 1, 1], [], []>} : vector<16x128xf32>, vector<128x128xf32>, vector<16x128xf32> -> vector<16x128xf32>
    %c3 = arith.constant 3 : index
    %c0_22 = arith.constant 0 : index
    %27 = vector.load %arg4[%c3, %c0_22] : memref<6x128xf32, #tpu.memory_space<vmem>>, vector<1x128xf32>
    %28 = vector.broadcast %27 : vector<1x128xf32> to vector<16x128xf32>
    %29 = arith.addf %26, %28 : vector<16x128xf32>
    %cst_23 = arith.constant 0.000000e+00 : f32
    %30 = vector.broadcast %cst_23 : f32 to vector<16x128xf32>
    %31 = arith.maximumf %29, %30 : vector<16x128xf32>
    %c3_24 = arith.constant 3 : index
    %c0_25 = arith.constant 0 : index
    %c0_26 = arith.constant 0 : index
    %32 = vector.load %arg3[%c3_24, %c0_25, %c0_26] : memref<5x128x128xf32, #tpu.memory_space<vmem>>, vector<1x128x128xf32>
    %33 = vector.shape_cast %32 : vector<1x128x128xf32> to vector<128x128xf32>
    %cst_27 = arith.constant dense<0.000000e+00> : vector<16x128xf32>
    %34 = tpu.matmul %31, %33, %cst_27 {dimension_numbers = #tpu.dot_dimension_numbers<[1], [0], [0], [1], [0, 0, 1, 1], [], []>} : vector<16x128xf32>, vector<128x128xf32>, vector<16x128xf32> -> vector<16x128xf32>
    %c4 = arith.constant 4 : index
    %c0_28 = arith.constant 0 : index
    %35 = vector.load %arg4[%c4, %c0_28] : memref<6x128xf32, #tpu.memory_space<vmem>>, vector<1x128xf32>
    %36 = vector.broadcast %35 : vector<1x128xf32> to vector<16x128xf32>
    %37 = arith.addf %34, %36 : vector<16x128xf32>
    %cst_29 = arith.constant 0.000000e+00 : f32
    %38 = vector.broadcast %cst_29 : f32 to vector<16x128xf32>
    %39 = arith.maximumf %37, %38 : vector<16x128xf32>
    %c4_30 = arith.constant 4 : index
    %c0_31 = arith.constant 0 : index
    %c0_32 = arith.constant 0 : index
    %40 = vector.load %arg3[%c4_30, %c0_31, %c0_32] : memref<5x128x128xf32, #tpu.memory_space<vmem>>, vector<1x128x128xf32>
    %41 = vector.shape_cast %40 : vector<1x128x128xf32> to vector<128x128xf32>
    %cst_33 = arith.constant dense<0.000000e+00> : vector<16x128xf32>
    %42 = tpu.matmul %39, %41, %cst_33 {dimension_numbers = #tpu.dot_dimension_numbers<[1], [0], [0], [1], [0, 0, 1, 1], [], []>} : vector<16x128xf32>, vector<128x128xf32>, vector<16x128xf32> -> vector<16x128xf32>
    %c5 = arith.constant 5 : index
    %c0_34 = arith.constant 0 : index
    %43 = vector.load %arg4[%c5, %c0_34] : memref<6x128xf32, #tpu.memory_space<vmem>>, vector<1x128xf32>
    %44 = vector.broadcast %43 : vector<1x128xf32> to vector<16x128xf32>
    %45 = arith.addf %42, %44 : vector<16x128xf32>
    %c0_35 = arith.constant 0 : index
    %c0_36 = arith.constant 0 : index
    %46 = vector.load %arg5[%c0_35, %c0_36] : memref<16x128xf32, #tpu.memory_space<vmem>>, vector<16x128xf32>
    tpu.vector_store %arg5[%c0_35, %c0_36], %45 {strides = array<i32>} : memref<16x128xf32, #tpu.memory_space<vmem>>, vector<16x128xf32>,
    return
  }
  func.func @transform_0(%arg0: i32) -> (i32, i32) {
    %c0_i32 = arith.constant 0 : i32
    %c0_i32_0 = arith.constant 0 : i32
    return %arg0, %c0_i32 : i32, i32
  }
  func.func @transform_1(%arg0: i32) -> (i32, i32) {
    %c0_i32 = arith.constant 0 : i32
    %c0_i32_0 = arith.constant 0 : i32
    %c0_i32_1 = arith.constant 0 : i32
    return %c0_i32, %c0_i32_0 : i32, i32
  }
  func.func @transform_2(%arg0: i32) -> (i32, i32, i32) {
    %c0_i32 = arith.constant 0 : i32
    %c0_i32_0 = arith.constant 0 : i32
    %c0_i32_1 = arith.constant 0 : i32
    %c0_i32_2 = arith.constant 0 : i32
    return %c0_i32, %c0_i32_0, %c0_i32_1 : i32, i32, i32
  }
  func.func @transform_3(%arg0: i32) -> (i32, i32) {
    %c0_i32 = arith.constant 0 : i32
    %c0_i32_0 = arith.constant 0 : i32
    %c0_i32_1 = arith.constant 0 : i32
    return %c0_i32, %c0_i32_0 : i32, i32
  }
  func.func @transform_4(%arg0: i32) -> (i32, i32) {
    %c0_i32 = arith.constant 0 : i32
    %c0_i32_0 = arith.constant 0 : i32
    return %arg0, %c0_i32 : i32, i32
  }
}

</mosaic_0001>

<bundles_post_ra>
// kernel: tpu_custom_call.1
= control target key start
LH: loop header
LB: loop body
LE: loop exit
PB: predicated region body
PF: predicated region fallthrough
CT: control target
= control target key end

     0   :  { %9 = vsyncpa [#allocation3], 0  ;;  %s577_s0 = inlined_call_operand.hbm [shape: f32[16,32], index: 0, kind: input, shape index: {}]   ;;  %s578_s1 = inlined_call_operand.hbm [shape: f32[32,128], index: 1, kind: input, shape index: {}]   ;;  %s579_s2 = inlined_call_operand.hbm [shape: f32[5,128,128], index: 2, kind: input, shape index: {}]   ;;  %s580_s3 = inlined_call_operand.hbm [shape: f32[6,128], index: 3, kind: input, shape index: {}]   ;;  %s581_s4 = inlined_call_operand.hbm [shape: f32[16,128], index: 4, kind: output, shape index: {}]  }
   0x1   :  { %10 = vsyncpa [#allocation6], 0 }
   0x2   :  { %11 = vsyncpa [#allocation9], 0 }
   0x3   :  { %12 = vsyncpa [#allocation4], 0  ;;  %s30_s17 = sshll.u32 %s578_s1, 4  ;;  %s518_s18 = smov [#allocation5]   ;;  %s31_s17 = int_to_ptr.hbm [resolvable:$true] %s30_s17 }
   0x4   :  { %s32_s19 = sshll.u32 %s518_s18, 4  ;;  %s17_s22 = sshll.u32 %s577_s0, 4  ;;  %s33_s19 = int_to_ptr.vmem [resolvable:$true] %s32_s19  ;;  %s18_s22 = int_to_ptr.hbm [resolvable:$true] %s17_s22 }
   0x5   :  { %s519_s23 = smov 128   ;;  %s520_s24 = smov 8  }
   0x6   :  { %38 = dma.hbm_to_vmem [thread:$0]  %s31_s17, 512, %s33_s19, [#allocation6], %s519_s23, %s519_s23, %s520_s24  }
   0x7   :  { %s521_s25 = smov [#allocation2]   ;;  %s43_s1 = sshll.u32 %s579_s2, 4  ;;  %s44_s1 = int_to_ptr.hbm [resolvable:$true] %s43_s1 }
   0x8   :  { %s19_s26 = sshll.u32 %s521_s25, 4  ;;  %s57_s30 = sshll.u32 %s580_s3, 4  ;;  %s20_s26 = int_to_ptr.vmem [resolvable:$true] %s19_s26  ;;  %s58_s30 = int_to_ptr.hbm [resolvable:$true] %s57_s30 }
   0x9   :  { %25 = dma.hbm_to_vmem [thread:$0]  %s18_s22, 256, %s20_s26, [#allocation3], %s519_s23, %s519_s23, %s520_s24  }
   0xa   :  { %s522_s5 = smov [#allocation7]   ;;  %s523_s7 = smov [#allocation8]  }
   0xb   :  { %s45_s6 = sshll.u32 %s522_s5, 4  ;;  %s59_s2 = sshll.u32 %s523_s7, 4  ;;  %s46_s6 = int_to_ptr.vmem [resolvable:$true] %s45_s6  ;;  %s60_s2 = int_to_ptr.vmem [resolvable:$true] %s59_s2 }
   0xc   :  { %51 = dma.hbm_to_vmem [thread:$0]  %s44_s1, 10240, %s46_s6, [#allocation6], %s519_s23, %s519_s23, %s520_s24  }
   0xd   :  { %62 = dma.hbm_to_vmem [thread:$0]  %s58_s30, 128, %s60_s2, [#allocation9]  }
   0xe   :  { %510 = dma.done.wait [#allocation3], 256  }
   0xf   :  { %511 = vsyncadd [#allocation3], 4294967040 }
  0x10   :  { %512 = dma.done.wait [#allocation6], 10752  }
  0x11   :  { %513 = vsyncadd [#allocation6], 4294956544 }
  0x12   :  { %514 = dma.done.wait [#allocation9], 128  }
  0x13   :  { %515 = vsyncadd [#allocation9], 4294967168  ;;  %v84_v0 = vld [vmem:[#allocation5 + $0x18] sm:$0xff]  ;;  %v83_v1 = vld [vmem:[#allocation5 + $0x10] sm:$0xff]  ;;  %vm87_vm0 = vcmask 261120   ;;  %s524_s3 = smov [#allocation10]  }
  0x14   :  { %106 = vmatpush.msra.mxu0 %v84_v0  ;;  %v82_v2 = vld [vmem:[#allocation5 + $0x8] sm:$0xff]  ;;  %v134_v3 = vld [vmem:[#allocation7 + $0x78] sm:$0xff]  ;;  %v133_v4 = vld [vmem:[#allocation7 + $0x70] sm:$0xff]  ;;  %s342_s8 = sshll.u32 %s524_s3, 4  ;;  %s344_s11 = sshll.u32 %s581_s4, 4  ;;  %s343_s8 = int_to_ptr.vmem [resolvable:$true] %s342_s8  ;;  %s345_s11 = int_to_ptr.hbm [resolvable:$true] %s344_s11 }
  0x15   :  { %137 = vmatpush.msra.mxu1 %v134_v3  ;;  %v81_v5 = vld [vmem:[#allocation5] sm:$0xff]  ;;  %v132_v6 = vld [vmem:[#allocation7 + $0x68] sm:$0xff]  ;;  %v79_v7 = vld [vmem:[#allocation2] sm:$0xff] }
  0x16   :  { %107 = vmatpush.msra.mxu0 %v83_v1  ;;  %v131_v8 = vld [vmem:[#allocation7 + $0x60] sm:$0xff]  ;;  %v130_v9 = vld [vmem:[#allocation7 + $0x58] sm:$0xff]  ;;  %v129_v10 = vld [vmem:[#allocation7 + $0x50] sm:$0xff] }
  0x17   :  { %138 = vmatpush.msra.mxu1 %v133_v4  ;;  %v128_v11 = vld [vmem:[#allocation7 + $0x48] sm:$0xff]  ;;  %v80_v12 = vld [vmem:[#allocation2 + $0x8] sm:$0xff]  ;;  %v127_v13 = vld [vmem:[#allocation7 + $0x40] sm:$0xff] }
  0x18   :  { %108 = vmatpush.msra.mxu0 %v82_v2  ;;  %v126_v14 = vld [vmem:[#allocation7 + $0x38] sm:$0xff]  ;;  %v125_v15 = vld [vmem:[#allocation7 + $0x30] sm:$0xff]  ;;  %v124_v16 = vld [vmem:[#allocation7 + $0x28] sm:$0xff] }
  0x19   :  { %139 = vmatpush.msra.mxu1 %v132_v6  ;;  %v123_v17 = vld [vmem:[#allocation7 + $0x20] sm:$0xff]  ;;  %v122_v18 = vld [vmem:[#allocation7 + $0x18] sm:$0xff]  ;;  %v121_v19 = vld [vmem:[#allocation7 + $0x10] sm:$0xff] }
  0x1a   :  { %109 = vmatpush.msra.mxu0 %v81_v5  ;;  %v120_v20 = vld [vmem:[#allocation7 + $0x8] sm:$0xff]  ;;  %v119_v21 = vld [vmem:[#allocation7] sm:$0xff]  ;;  %v178_v22 = vld [vmem:[#allocation7 + $0xf8] sm:$0xff] }
  0x1b   :  { %359 = vmatmul.msk.f32.vlgmr.msra.gmra.mxu0 %vm87_vm0, %v79_v7  ;;  %140 = vmatpush.msra.mxu1 %v131_v8  ;;  %v177_v23 = vld [vmem:[#allocation7 + $0xf0] sm:$0xff]  ;;  %v176_v24 = vld [vmem:[#allocation7 + $0xe8] sm:$0xff]  ;;  %v175_v25 = vld [vmem:[#allocation7 + $0xe0] sm:$0xff] }
  0x1c   :  { %181 = vmatpush.msra.mxu2 %v178_v22  ;;  %v174_v26 = vld [vmem:[#allocation7 + $0xd8] sm:$0xff]  ;;  %v173_v27 = vld [vmem:[#allocation7 + $0xd0] sm:$0xff]  ;;  %v172_v28 = vld [vmem:[#allocation7 + $0xc8] sm:$0xff] }
  0x1d   :  { %141 = vmatpush.msra.mxu1 %v130_v9  ;;  %v171_v29 = vld [vmem:[#allocation7 + $0xc0] sm:$0xff]  ;;  %v170_v30 = vld [vmem:[#allocation7 + $0xb8] sm:$0xff]  ;;  %v169_v32 = vld [vmem:[#allocation7 + $0xb0] sm:$0xff] }
  0x1e   :  { %182 = vmatpush.msra.mxu2 %v177_v23  ;;  %v384_v31 = vld [vmem:[#allocation8] ss:$0 sm:$0xff]  ;;  %v168_v33 = vld [vmem:[#allocation7 + $0xa8] sm:$0xff]  ;;  %v166_v38 = vld [vmem:[#allocation7 + $0x98] sm:$0xff] }
  0x1f   :  { %142 = vmatpush.msra.mxu1 %v129_v10  ;;  %v167_v36 = vld [vmem:[#allocation7 + $0xa0] sm:$0xff]  ;;  %v165_v42 = vld [vmem:[#allocation7 + $0x90] sm:$0xff]  ;;  %v164_v43 = vld [vmem:[#allocation7 + $0x88] sm:$0xff] }
  0x20   :  { %183 = vmatpush.msra.mxu2 %v176_v24  ;;  %v163_v44 = vld [vmem:[#allocation7 + $0x80] sm:$0xff]  ;;  %v222_v45 = vld [vmem:[#allocation7 + $0x178] sm:$0xff]  ;;  %v221_v46 = vld [vmem:[#allocation7 + $0x170] sm:$0xff] }
  0x21   :  { %143 = vmatpush.msra.mxu1 %v128_v11  ;;  %225 = vmatpush.msra.mxu3 %v222_v45  ;;  %v220_v47 = vld [vmem:[#allocation7 + $0x168] sm:$0xff]  ;;  %v219_v48 = vld [vmem:[#allocation7 + $0x160] sm:$0xff]  ;;  %v218_v49 = vld [vmem:[#allocation7 + $0x158] sm:$0xff] }
  0x22   :  { %184 = vmatpush.msra.mxu2 %v175_v25  ;;  %v217_v50 = vld [vmem:[#allocation7 + $0x150] sm:$0xff]  ;;  %v216_v51 = vld [vmem:[#allocation7 + $0x148] sm:$0xff]  ;;  %v215_v52 = vld [vmem:[#allocation7 + $0x140] sm:$0xff] }
  0x23   :  { %360 = vmatmul.msk.f32.gmra.mxu0 %vm87_vm0, %v80_v12  ;;  %144 = vmatpush.msra.mxu1 %v127_v13  ;;  %v214_v53 = vld [vmem:[#allocation7 + $0x138] sm:$0xff]  ;;  %v385_v54 = vld [vmem:[#allocation8 + $0x1] ss:$0 sm:$0xff]  ;;  %v213_v55 = vld [vmem:[#allocation7 + $0x130] sm:$0xff] }
  0x24   :  { %185 = vmatpush.msra.mxu2 %v174_v26  ;;  %226 = vmatpush.msra.mxu3 %v221_v46  ;;  %v212_v56 = vld [vmem:[#allocation7 + $0x128] sm:$0xff]  ;;  %v211_v59 = vld [vmem:[#allocation7 + $0x120] sm:$0xff]  ;;  %v210_v61 = vld [vmem:[#allocation7 + $0x118] sm:$0xff] }
  0x25   :  { %145 = vmatpush.msra.mxu1 %v126_v14  ;;  %v209_v1 = vld [vmem:[#allocation7 + $0x110] sm:$0xff]  ;;  %v208_v2 = vld [vmem:[#allocation7 + $0x108] sm:$0xff]  ;;  %v207_v3 = vld [vmem:[#allocation7 + $0x100] sm:$0xff] }
  0x26   :  { %186 = vmatpush.msra.mxu2 %v173_v27  ;;  %227 = vmatpush.msra.mxu3 %v220_v47  ;;  %v266_v4 = vld [vmem:[#allocation7 + $0x1f8] sm:$0xff]  ;;  %v265_v5 = vld [vmem:[#allocation7 + $0x1f0] sm:$0xff]  ;;  %v264_v6 = vld [vmem:[#allocation7 + $0x1e8] sm:$0xff] }
  0x27   :  { %146 = vmatpush.msra.mxu1 %v125_v15  ;;  %269 = vmatpush.msrb.mxu0 %v266_v4  ;;  %v263_v7 = vld [vmem:[#allocation7 + $0x1e0] sm:$0xff]  ;;  %v262_v8 = vld [vmem:[#allocation7 + $0x1d8] sm:$0xff]  ;;  %v261_v9 = vld [vmem:[#allocation7 + $0x1d0] sm:$0xff] }
  0x28   :  { %187 = vmatpush.msra.mxu2 %v172_v28  ;;  %228 = vmatpush.msra.mxu3 %v219_v48  ;;  %v260_v10 = vld [vmem:[#allocation7 + $0x1c8] sm:$0xff]  ;;  %v259_v11 = vld [vmem:[#allocation7 + $0x1c0] sm:$0xff]  ;;  %v258_v12 = vld [vmem:[#allocation7 + $0x1b8] sm:$0xff] }
  0x29   :  { %147 = vmatpush.msra.mxu1 %v124_v16  ;;  %270 = vmatpush.msrb.mxu0 %v265_v5  ;;  %v386_v13 = vld [vmem:[#allocation8 + $0x2] ss:$0 sm:$0xff]  ;;  %v257_v14 = vld [vmem:[#allocation7 + $0x1b0] sm:$0xff]  ;;  %v256_v15 = vld [vmem:[#allocation7 + $0x1a8] sm:$0xff] }
  0x2a   :  { %188 = vmatpush.msra.mxu2 %v171_v29  ;;  %229 = vmatpush.msra.mxu3 %v218_v49  ;;  %v253_v24 = vld [vmem:[#allocation7 + $0x190] sm:$0xff]  ;;  %v252_v25 = vld [vmem:[#allocation7 + $0x188] sm:$0xff]  ;;  %v251_v26 = vld [vmem:[#allocation7 + $0x180] sm:$0xff] }
  0x2b   :  { %148 = vmatpush.msra.mxu1 %v123_v17  ;;  %271 = vmatpush.msrb.mxu0 %v264_v6  ;;  %v310_v27 = vld [vmem:[#allocation7 + $0x278] sm:$0xff]  ;;  %v309_v28 = vld [vmem:[#allocation7 + $0x270] sm:$0xff]  ;;  %v308_v29 = vld [vmem:[#allocation7 + $0x268] sm:$0xff] }
  0x2c   :  { %189 = vmatpush.msra.mxu2 %v170_v30  ;;  %230 = vmatpush.msra.mxu3 %v217_v50  ;;  %v307_v30 = vld [vmem:[#allocation7 + $0x260] sm:$0xff]  ;;  %v297_v47 = vld [vmem:[#allocation7 + $0x210] sm:$0xff]  ;;  %v296_v48 = vld [vmem:[#allocation7 + $0x208] sm:$0xff] }
  0x2d   :  { %149 = vmatpush.msra.mxu1 %v122_v18  ;;  %272 = vmatpush.msrb.mxu0 %v263_v7  ;;  %v255_v18 = vld [vmem:[#allocation7 + $0x1a0] sm:$0xff] }
  0x2e   :  { %190 = vmatpush.msra.mxu2 %v169_v32  ;;  %231 = vmatpush.msra.mxu3 %v216_v51  ;;  %v305_v32 = vld [vmem:[#allocation7 + $0x250] sm:$0xff]  ;;  %v295_v49 = vld [vmem:[#allocation7 + $0x200] sm:$0xff] }
  0x2f   :  { %150 = vmatpush.msra.mxu1 %v121_v19  ;;  %273 = vmatpush.msrb.mxu0 %v262_v8  ;;  %v388_v50 = vld [vmem:[#allocation8 + $0x4] ss:$0 sm:$0xff] }
  0x30   :  { %191 = vmatpush.msra.mxu2 %v168_v33  ;;  %232 = vmatpush.msra.mxu3 %v215_v52  ;;  %v304_v33 = vld [vmem:[#allocation7 + $0x248] sm:$0xff] }
  0x31   :  { %151 = vmatpush.msra.mxu1 %v120_v20  ;;  %274 = vmatpush.msrb.mxu0 %v261_v9  ;;  %v254_v20 = vld [vmem:[#allocation7 + $0x198] sm:$0xff] }
  0x32   :  { %192 = vmatpush.msra.mxu2 %v167_v36  ;;  %233 = vmatpush.msra.mxu3 %v214_v53  ;;  %v387_v36 = vld [vmem:[#allocation8 + $0x3] ss:$0 sm:$0xff] }
  0x33   :  { %152 = vmatpush.msra.mxu1 %v119_v21  ;;  %275 = vmatpush.msrb.mxu0 %v260_v10 }
  0x34   :  { %193 = vmatpush.msra.mxu2 %v166_v38  ;;  %234 = vmatpush.msra.mxu3 %v213_v55  ;;  %v300_v38 = vld [vmem:[#allocation7 + $0x228] sm:$0xff] }
  0x35   :  { %276 = vmatpush.msrb.mxu0 %v259_v11  ;;  %313 = vmatpush.msrb.mxu1 %v310_v27 }
  0x36   :  { %194 = vmatpush.msra.mxu2 %v165_v42  ;;  %235 = vmatpush.msra.mxu3 %v212_v56 }
  0x37   :  { %277 = vmatpush.msrb.mxu0 %v258_v12  ;;  %314 = vmatpush.msrb.mxu1 %v309_v28 }
  0x38   :  { %195 = vmatpush.msra.mxu2 %v164_v43  ;;  %236 = vmatpush.msra.mxu3 %v211_v59  ;;  %v298_v43 = vld [vmem:[#allocation7 + $0x218] sm:$0xff] }
  0x39   :  { %278 = vmatpush.msrb.mxu0 %v257_v14  ;;  %315 = vmatpush.msrb.mxu1 %v308_v29 }
  0x3a   :  { %196 = vmatpush.msra.mxu2 %v163_v44  ;;  %237 = vmatpush.msra.mxu3 %v210_v61 }
  0x3b   :  { %279 = vmatpush.msrb.mxu0 %v256_v15  ;;  %316 = vmatpush.msrb.mxu1 %v307_v30 }
  0x3c   :  { %238 = vmatpush.msra.mxu3 %v209_v1  ;;  %361 = vmatpush.msrb.mxu2 %v310_v27 }
  0x3d   :  { %280 = vmatpush.msrb.mxu0 %v255_v18 }
  0x3e   :  { %239 = vmatpush.msra.mxu3 %v208_v2  ;;  %362 = vmatpush.msrb.mxu2 %v309_v28 }
  0x3f   :  { %281 = vmatpush.msrb.mxu0 %v254_v20 }
  0x40   :  { %240 = vmatpush.msra.mxu3 %v207_v3  ;;  %363 = vmatpush.msrb.mxu2 %v308_v29 }
  0x41   :  { %282 = vmatpush.msrb.mxu0 %v253_v24 }
  0x42   :  { %364 = vmatpush.msrb.mxu2 %v307_v30 }
  0x43   :  { %283 = vmatpush.msrb.mxu0 %v252_v25 }
  0x45   :  { %284 = vmatpush.msrb.mxu0 %v251_v26 }
  0x98   :  { %v111_v34 = vpop.f32.mrf.mxu0 }
  0x99   :  { %v112_v35 = vadd.f32 %v384_v31, %v111_v34  ;;  %v303_v34 = vld [vmem:[#allocation7 + $0x240] sm:$0xff] }
  0x9b   :  { %v117_v37 = vmax.f32 %v112_v35, 0.0  ;;  %v302_v35 = vld [vmem:[#allocation7 + $0x238] sm:$0xff] }
  0x9d   :  { %153 = vmatmul.f32.vlgmr.msra.gmra.mxu1 %v117_v37  ;;  %v301_v37 = vld [vmem:[#allocation7 + $0x230] sm:$0xff] }
  0xa0   :  { %v114_v39 = vpop.f32.mrf.mxu0 }
  0xa1   :  { %v115_v40 = vadd.f32 %v384_v31, %v114_v39  ;;  %v306_v31 = vld [vmem:[#allocation7 + $0x258] sm:$0xff] }
  0xa2   :  { %317 = vmatpush.msrb.mxu1 %v306_v31  ;;  %365 = vmatpush.msrb.mxu2 %v306_v31 }
  0xa3   :  { %v118_v41 = vmax.f32 %v115_v40, 0.0 }
  0xa4   :  { %318 = vmatpush.msrb.mxu1 %v305_v32  ;;  %366 = vmatpush.msrb.mxu2 %v305_v32 }
  0xa5   :  { %156 = vmatmul.f32.gmra.mxu1 %v118_v41  ;;  %v299_v41 = vld [vmem:[#allocation7 + $0x220] sm:$0xff] }
  0xa6   :  { %319 = vmatpush.msrb.mxu1 %v304_v33  ;;  %367 = vmatpush.msrb.mxu2 %v304_v33 }
  0xa8   :  { %320 = vmatpush.msrb.mxu1 %v303_v34  ;;  %368 = vmatpush.msrb.mxu2 %v303_v34 }
  0xaa   :  { %321 = vmatpush.msrb.mxu1 %v302_v35  ;;  %369 = vmatpush.msrb.mxu2 %v302_v35 }
  0xac   :  { %322 = vmatpush.msrb.mxu1 %v301_v37  ;;  %370 = vmatpush.msrb.mxu2 %v301_v37 }
  0xae   :  { %323 = vmatpush.msrb.mxu1 %v300_v38  ;;  %371 = vmatpush.msrb.mxu2 %v300_v38 }
  0xb0   :  { %324 = vmatpush.msrb.mxu1 %v299_v41  ;;  %372 = vmatpush.msrb.mxu2 %v299_v41 }
  0xb2   :  { %325 = vmatpush.msrb.mxu1 %v298_v43  ;;  %373 = vmatpush.msrb.mxu2 %v298_v43 }
  0xb4   :  { %326 = vmatpush.msrb.mxu1 %v297_v47  ;;  %374 = vmatpush.msrb.mxu2 %v297_v47 }
  0xb6   :  { %327 = vmatpush.msrb.mxu1 %v296_v48  ;;  %375 = vmatpush.msrb.mxu2 %v296_v48 }
  0xb8   :  { %328 = vmatpush.msrb.mxu1 %v295_v49  ;;  %376 = vmatpush.msrb.mxu2 %v295_v49 }
 0x11a   :  { %v154_v57 = vpop.f32.mrf.mxu1 }
 0x11b   :  { %v155_v58 = vadd.f32 %v385_v54, %v154_v57  ;;  %v389_v57 = vld [vmem:[#allocation8 + $0x5] ss:$0 sm:$0xff] }
 0x11d   :  { %v160_v60 = vmax.f32 %v155_v58, 0.0 }
 0x11f   :  { %197 = vmatmul.f32.vlgmr.msra.gmra.mxu2 %v160_v60 }
 0x122   :  { %v157_v62 = vpop.f32.mrf.mxu1 }
 0x123   :  { %v158_v63 = vadd.f32 %v385_v54, %v157_v62 }
 0x125   :  { %v161_v0 = vmax.f32 %v158_v63, 0.0 }
 0x127   :  { %200 = vmatmul.f32.gmra.mxu2 %v161_v0 }
 0x1a2   :  { %v198_v16 = vpop.f32.mrf.mxu2 }
 0x1a3   :  { %v199_v17 = vadd.f32 %v386_v13, %v198_v16 }
 0x1a5   :  { %v204_v19 = vmax.f32 %v199_v17, 0.0 }
 0x1a7   :  { %241 = vmatmul.f32.vlgmr.msra.gmra.mxu3 %v204_v19 }
 0x1aa   :  { %v201_v21 = vpop.f32.mrf.mxu2 }
 0x1ab   :  { %v202_v22 = vadd.f32 %v386_v13, %v201_v21 }
 0x1ad   :  { %v205_v23 = vmax.f32 %v202_v22, 0.0 }
 0x1af   :  { %244 = vmatmul.f32.gmra.mxu3 %v205_v23 }
 0x22a   :  { %v242_v39 = vpop.f32.mrf.mxu3 }
 0x22b   :  { %v243_v40 = vadd.f32 %v387_v36, %v242_v39 }
 0x22d   :  { %v248_v42 = vmax.f32 %v243_v40, 0.0 }
 0x22f   :  { %285 = vmatmul.f32.vlgmr.msrb.gmra.mxu0 %v248_v42 }
 0x232   :  { %v245_v44 = vpop.f32.mrf.mxu3 }
 0x233   :  { %v246_v45 = vadd.f32 %v387_v36, %v245_v44 }
 0x235   :  { %v249_v46 = vmax.f32 %v246_v45, 0.0 }
 0x237   :  { %288 = vmatmul.f32.gmra.mxu0 %v249_v46 }
 0x2ac   :  { %v286_v51 = vpop.f32.mrf.mxu0 }
 0x2ad   :  { %v287_v52 = vadd.f32 %v388_v50, %v286_v51 }
 0x2af   :  { %v292_v53 = vmax.f32 %v287_v52, 0.0 }
 0x2b1   :  { %329 = vmatmul.f32.vlgmr.msrb.gmra.mxu1 %v292_v53 }
 0x2b4   :  { %v289_v54 = vpop.f32.mrf.mxu0 }
 0x2b5   :  { %v290_v55 = vadd.f32 %v388_v50, %v289_v54 }
 0x2b7   :  { %v293_v56 = vmax.f32 %v290_v55, 0.0 }
 0x2b9   :  { %332 = vmatmul.f32.vlgmr.msrb.gmra.mxu2 %v293_v56 }
 0x32e   :  { %v330_v58 = vpop.f32.mrf.mxu1 }
 0x32f   :  { %v331_v59 = vadd.f32 %v389_v57, %v330_v58 }
 0x331   :  { %336 = vst [vmem:[#allocation10] sm:$0xff] %v331_v59 }
 0x33c   :  { %v333_v60 = vpop.f32.mrf.mxu2 }
 0x33d   :  { %v334_v61 = vadd.f32 %v389_v57, %v333_v60 }
 0x33f   :  { %337 = vst [vmem:[#allocation10 + $0x8] sm:$0xff] %v334_v61 }
 0x340   :  { %350 = dma.vmem_to_hbm [thread:$0]  %s343_s8, 256, %s345_s11, [#allocation4], %s519_s23, %s519_s23, %s520_s24  }
 0x341   :  { %516 = dma.done.wait [#allocation4], 256  }
 0x342   :  { %517 = vsyncadd [#allocation4], 4294967040 }
 0x343   :  { %355 = vsyncpa [#allocation3], 1 }
 0x344   :  { %356 = vsyncpa [#allocation6], 1 }
 0x345   :  { %357 = vsyncpa [#allocation9], 1 }
 0x346   :  { %358 = vsyncpa [#allocation4], 1 }

</bundles_post_ra>
